<compile_context>
chip_gen: v6e
topology: v6e:2x2x1
jax: 0.10.0
libtpu: 0.0.40
codegen_flags: <defaults>
</compile_context>

<pallas_src>
from functools import partial

import jax
import jax.numpy as jnp
from jax.experimental import pallas as pl
from jax.experimental.pallas import tpu as pltpu

_INV_SQRT2 = 0.7071067811865476


# -----------------------------------------------------------------------------
# Kernel: one fused MXU pass + GELU + second MXU pass + 3 LayerNorms per tile.
# -----------------------------------------------------------------------------
def _stem_kernel(d_chid, d_t, d_a, approx_gelu,
                 x_ref,                                   # (tile_n, d_in) packed rows
                 wbig_ref, bbig_ref,                      # (d_in, 192), (1, 192)
                 wc2_ref, bc2_ref,                        # (128, 96),  (1, 96)
                 gt_ref, bet_ref,                         # time LayerNorm
                 ga_ref, bea_ref,                         # account LayerNorm
                 gc_ref, bec_ref,                         # candlesticks LayerNorm
                 out_ref):                                # (tile_n, 64 + 96)
    eps = jnp.float32(1e-5)  # PyTorch nn.LayerNorm default

    def layernorm(x, gamma, beta):
        # two-pass (centered) stats: robust against |mean| >> std cancellation
        mu = jnp.mean(x, axis=-1, keepdims=True)
        xc = x - mu
        var = jnp.mean(xc * xc, axis=-1, keepdims=True)
        return xc * jax.lax.rsqrt(var + eps) * gamma + beta

    # Weights arrive in either f32 (exact) or bf16 (perf flag); cast activations
    # to match so the MXU runs at the weights' rate, accumulate in f32.
    mm_dtype = wbig_ref.dtype

    # --- fused first matmul: candlesticks hidden + time pre-act + account pre-act
    x = x_ref[...].astype(mm_dtype)
    h = jnp.dot(x, wbig_ref[...],
                preferred_element_type=jnp.float32) + bbig_ref[...]

    # --- internal branch: LayerNorm the two 32-lane slices -------------------
    t = layernorm(h[:, d_chid:d_chid + d_t], gt_ref[...], bet_ref[...])
    a = layernorm(h[:, d_chid + d_t:d_chid + d_t + d_a], ga_ref[...], bea_ref[...])

    # --- external branch: GELU -> second matmul -> LayerNorm -----------------
    hc = h[:, :d_chid]
    if approx_gelu:
        # tanh-approx GELU: transcendental lands on the EUP slot (nearly free)
        hc = jax.nn.gelu(hc, approximate=True)
    else:
        # exact GELU (PyTorch nn.GELU default): 0.5*x*(1+erf(x/sqrt(2)))
        hc = 0.5 * hc * (1.0 + jax.lax.erf(hc * jnp.float32(_INV_SQRT2)))

    c = jnp.dot(hc.astype(mm_dtype), wc2_ref[...],
                preferred_element_type=jnp.float32) + bc2_ref[...]
    ext = layernorm(c, gc_ref[...], bec_ref[...])

    # single fused store: [time_enc(32) | account_enc(32) | candlesticks_enc(96)]
    out_ref[...] = jnp.concatenate([t, a, ext], axis=-1)


# -----------------------------------------------------------------------------
# Wrapper: pack inputs / build block-diagonal weight, call the kernel, split out.
# -----------------------------------------------------------------------------
def stem_forward(params, obs_time, obs_account, obs_candles, *,
                 tile_rows=2048, approx_gelu=False, bf16_matmul=False,
                 vmem_limit_bytes=32 * 1024 * 1024):
    B, T, d_obs_time = obs_time.shape
    d_account = obs_account.shape[-1]
    d_candles = obs_candles.shape[-1]
    N = B * T

    # Dimensions derived from the parameters (match the nn.Module defaults).
    d_time_enc = params["w_time"].shape[1]        # 32
    d_account_enc = params["w_acct"].shape[1]     # 32
    d_chid = params["w_c1"].shape[1]              # 128
    d_candles_enc = params["w_c2"].shape[1]       # 96
    d_internal = d_time_enc + d_account_enc       # 64
    d_out = d_internal + d_candles_enc            # 160
    d_in = d_candles + 1 + d_obs_time + d_account  # 39

    f32 = jnp.float32

    # Absolute-time column == torch.linspace(0, 1, T) broadcast over batch.
    time_abs = jnp.broadcast_to(
        jnp.linspace(0.0, 1.0, T, dtype=f32).reshape(1, T, 1), (B, T, 1))

    # One packed, lane-dense input slab -> a single row DMA stream per step.
    x = jnp.concatenate(
        [obs_candles.astype(f32), time_abs,
         obs_time.astype(f32), obs_account.astype(f32)],
        axis=-1).reshape(N, d_in)

    # Block-diagonal fused weight: x @ W_big = [h_pre(128) | t_pre(32) | a_pre(32)]
    d_mm = d_chid + d_time_enc + d_account_enc     # 192
    w_big = jnp.zeros((d_in, d_mm), f32)
    w_big = w_big.at[:d_candles, :d_chid].set(params["w_c1"])
    w_big = w_big.at[d_candles:d_candles + 1 + d_obs_time,
                     d_chid:d_chid + d_time_enc].set(params["w_time"])
    w_big = w_big.at[d_candles + 1 + d_obs_time:,
                     d_chid + d_time_enc:].set(params["w_acct"])
    b_big = jnp.concatenate(
        [params["b_c1"], params["b_time"], params["b_acct"]], axis=-1)

    w_c2, b_c2 = params["w_c2"], params["b_c2"]
    if bf16_matmul:   # opt-in (changes numerics); mainly a v5e MXU-rate lever
        w_big = w_big.astype(jnp.bfloat16)
        w_c2 = w_c2.astype(jnp.bfloat16)

    # Row tile: full extent when small (always legal), else a multiple of 8.
    tile_n = N if N <= tile_rows else tile_rows
    grid = (pl.cdiv(N, tile_n),)

    param_list = [w_big, b_big, w_c2, b_c2,
                  params["g_time"], params["beta_time"],
                  params["g_acct"], params["beta_acct"],
                  params["g_c"], params["beta_c"]]

    def row_spec(feat):
        return pl.BlockSpec((tile_n, feat), lambda i: (i, 0))

    def resident_spec(p):
        # whole (small) parameter array, same block for every grid step
        return pl.BlockSpec(p.shape, lambda i: (0, 0))

    in_specs = [row_spec(d_in)] + [resident_spec(p) for p in param_list]
    out_specs = pl.BlockSpec((tile_n, d_out), lambda i: (i, 0))
    out_shape = jax.ShapeDtypeStruct((N, d_out), f32)

    fused = pl.pallas_call(
        partial(_stem_kernel, d_chid, d_time_enc, d_account_enc, approx_gelu),
        grid=grid,
        in_specs=in_specs,
        out_specs=out_specs,
        out_shape=out_shape,
        compiler_params=pltpu.CompilerParams(
            dimension_semantics=("parallel",),
            vmem_limit_bytes=vmem_limit_bytes),
    )(x, *param_list)

    fused = fused.reshape(B, T, d_out)
    internal = fused[..., :d_internal]
    external = fused[..., d_internal:]
    return internal, external


# -----------------------------------------------------------------------------
# Deterministic parameter initialization (synthetic; shapes match nn.Module).
# -----------------------------------------------------------------------------
def init_params(key, *, d_obs_time=2, d_time_enc=32, d_account_enc=32,
                d_candles_btc=34, d_candles_enc=96):
    d_candles_enc_btc = d_candles_enc * 4 // 3  # 128
    k = jax.random.split(key, 8)

    def lin_w(kk, din, dout):
        return jax.random.normal(kk, (din, dout), jnp.float32) * 0.05

    def lin_b(kk, dout):
        return jax.random.normal(kk, (1, dout), jnp.float32) * 0.05

    return {
        # TimeEncoding: Linear(d_obs_time+1 -> d_time_enc), LayerNorm(d_time_enc)
        "w_time": lin_w(k[0], d_obs_time + 1, d_time_enc),
        "b_time": lin_b(k[1], d_time_enc),
        "g_time": jnp.ones((1, d_time_enc), jnp.float32),
        "beta_time": jnp.zeros((1, d_time_enc), jnp.float32),
        # AccountEncoding: Linear(2 -> d_account_enc), LayerNorm(d_account_enc)
        "w_acct": lin_w(k[2], 2, d_account_enc),
        "b_acct": lin_b(k[3], d_account_enc),
        "g_acct": jnp.ones((1, d_account_enc), jnp.float32),
        "beta_acct": jnp.zeros((1, d_account_enc), jnp.float32),
        # CandlesticksEncoding: Linear(34 -> 128) + GELU, Linear(128 -> 96), LayerNorm(96)
        "w_c1": lin_w(k[4], d_candles_btc, d_candles_enc_btc),
        "b_c1": lin_b(k[5], d_candles_enc_btc),
        "w_c2": lin_w(k[6], d_candles_enc_btc, d_candles_enc),
        "b_c2": lin_b(k[7], d_candles_enc),
        "g_c": jnp.ones((1, d_candles_enc), jnp.float32),
        "beta_c": jnp.zeros((1, d_candles_enc), jnp.float32),
    }


# -----------------------------------------------------------------------------
# Pure-JAX reference (mirrors the PyTorch forward) for correctness checking.
# -----------------------------------------------------------------------------
def stem_reference(params, obs_time, obs_account, obs_candles, *, approx_gelu=False):
    B, T, _ = obs_time.shape
    eps = 1e-5

    def ln(x, g, b):
        mu = jnp.mean(x, axis=-1, keepdims=True)
        var = jnp.mean(jnp.square(x - mu), axis=-1, keepdims=True)
        return (x - mu) / jnp.sqrt(var + eps) * g + b

    time_abs = jnp.broadcast_to(
        jnp.linspace(0.0, 1.0, T, dtype=jnp.float32).reshape(1, T, 1), (B, T, 1))
    tc = jnp.concatenate([time_abs, obs_time], axis=-1)
    t = ln(tc @ params["w_time"] + params["b_time"], params["g_time"], params["beta_time"])
    a = ln(obs_account @ params["w_acct"] + params["b_acct"],
           params["g_acct"], params["beta_acct"])
    internal = jnp.concatenate([t, a], axis=-1)

    h = obs_candles @ params["w_c1"] + params["b_c1"]
    if approx_gelu:
        h = jax.nn.gelu(h, approximate=True)
    else:
        h = 0.5 * h * (1.0 + jax.lax.erf(h * _INV_SQRT2))
    c = h @ params["w_c2"] + params["b_c2"]
    external = ln(c, params["g_c"], params["beta_c"])
    return internal, external


if __name__ == "__main__":
    # Small shapes consistent with the module's forward:
    #   batch = 2, num_obs_in_history (Time) = 8, d_obs_time = 2, d_account = 2,
    #   d_candlesticks_btc = 34, d_time_enc = d_account_enc = 32, d_candlesticks_enc = 96
    B, T = 2, 8
    key = jax.random.PRNGKey(0)
    kp, kt, ka, kc = jax.random.split(key, 4)

    params = init_params(kp)
    obs_time = jax.random.normal(kt, (B, T, 2), jnp.float32)
    obs_account = jax.random.normal(ka, (B, T, 2), jnp.float32)
    obs_candles = jax.random.normal(kc, (B, T, 34), jnp.float32)

    internal, external = stem_forward(params, obs_time, obs_account, obs_candles)
    jax.block_until_ready((internal, external))

    ref_internal, ref_external = stem_reference(params, obs_time, obs_account, obs_candles)
    assert internal.shape == (B, T, 64) and external.shape == (B, T, 96)
    assert jnp.allclose(internal, ref_internal, atol=1e-4, rtol=1e-4)
    assert jnp.allclose(external, ref_external, atol=1e-4, rtol=1e-4)

    print("KERNEL_OK")
</pallas_src>

<mosaic_0001>
module attributes {stable_mosaic.version = 11 : i64} {
  func.func @_stem_kernel(%arg0: i32, %arg1: memref<16x39xf32, #tpu.memory_space<vmem>>, %arg2: memref<39x192xf32, #tpu.memory_space<vmem>>, %arg3: memref<1x192xf32, #tpu.memory_space<vmem>>, %arg4: memref<128x96xf32, #tpu.memory_space<vmem>>, %arg5: memref<1x96xf32, #tpu.memory_space<vmem>>, %arg6: memref<1x32xf32, #tpu.memory_space<vmem>>, %arg7: memref<1x32xf32, #tpu.memory_space<vmem>>, %arg8: memref<1x32xf32, #tpu.memory_space<vmem>>, %arg9: memref<1x32xf32, #tpu.memory_space<vmem>>, %arg10: memref<1x96xf32, #tpu.memory_space<vmem>>, %arg11: memref<1x96xf32, #tpu.memory_space<vmem>>, %arg12: memref<16x160xf32, #tpu.memory_space<vmem>>) attributes {dimension_semantics = [#tpu.dimension_semantics<parallel>], iteration_bounds = array<i64: 1>, scalar_prefetch = 0 : i64, scratch_operands = 0 : i64, tpu.core_type = #tpu.core_type<tc>, window_params = [{transform_indices = @transform_0, window_bounds = array<i64: 16, 39>}, {pipeline_mode = #tpu.pipeline_mode<synchronous>, transform_indices = @transform_1, window_bounds = array<i64: 39, 192>}, {pipeline_mode = #tpu.pipeline_mode<synchronous>, transform_indices = @transform_2, window_bounds = array<i64: 1, 192>}, {pipeline_mode = #tpu.pipeline_mode<synchronous>, transform_indices = @transform_3, window_bounds = array<i64: 128, 96>}, {pipeline_mode = #tpu.pipeline_mode<synchronous>, transform_indices = @transform_4, window_bounds = array<i64: 1, 96>}, {pipeline_mode = #tpu.pipeline_mode<synchronous>, transform_indices = @transform_5, window_bounds = array<i64: 1, 32>}, {pipeline_mode = #tpu.pipeline_mode<synchronous>, transform_indices = @transform_6, window_bounds = array<i64: 1, 32>}, {pipeline_mode = #tpu.pipeline_mode<synchronous>, transform_indices = @transform_7, window_bounds = array<i64: 1, 32>}, {pipeline_mode = #tpu.pipeline_mode<synchronous>, transform_indices = @transform_8, window_bounds = array<i64: 1, 32>}, {pipeline_mode = #tpu.pipeline_mode<synchronous>, transform_indices = @transform_9, window_bounds = array<i64: 1, 96>}, {pipeline_mode = #tpu.pipeline_mode<synchronous>, transform_indices = @transform_10, window_bounds = array<i64: 1, 96>}, {transform_indices = @transform_11, window_bounds = array<i64: 16, 160>}]} {
    %c0 = arith.constant 0 : index
    %c0_0 = arith.constant 0 : index
    %0 = vector.load %arg1[%c0, %c0_0] : memref<16x39xf32, #tpu.memory_space<vmem>>, vector<16x39xf32>
    %c0_1 = arith.constant 0 : index
    %c0_2 = arith.constant 0 : index
    %1 = vector.load %arg2[%c0_1, %c0_2] : memref<39x192xf32, #tpu.memory_space<vmem>>, vector<39x192xf32>
    %cst = arith.constant dense<0.000000e+00> : vector<16x192xf32>
    %2 = tpu.matmul %0, %1, %cst {dimension_numbers = #tpu.dot_dimension_numbers<[1], [0], [0], [1], [0, 0, 1, 1], [], []>} : vector<16x39xf32>, vector<39x192xf32>, vector<16x192xf32> -> vector<16x192xf32>
    %c0_3 = arith.constant 0 : index
    %c0_4 = arith.constant 0 : index
    %3 = vector.load %arg3[%c0_3, %c0_4] : memref<1x192xf32, #tpu.memory_space<vmem>>, vector<1x192xf32>
    %4 = vector.broadcast %3 : vector<1x192xf32> to vector<16x192xf32>
    %5 = arith.addf %2, %4 : vector<16x192xf32>
    %6 = vector.extract_strided_slice %5 {offsets = [0, 128], sizes = [16, 32], strides = [1, 1]} : vector<16x192xf32> to vector<16x32xf32>
    %c0_5 = arith.constant 0 : index
    %c0_6 = arith.constant 0 : index
    %7 = vector.load %arg6[%c0_5, %c0_6] : memref<1x32xf32, #tpu.memory_space<vmem>>, vector<1x32xf32>
    %c0_7 = arith.constant 0 : index
    %c0_8 = arith.constant 0 : index
    %8 = vector.load %arg7[%c0_7, %c0_8] : memref<1x32xf32, #tpu.memory_space<vmem>>, vector<1x32xf32>
    %cst_9 = arith.constant dense<0.000000e+00> : vector<16xf32>
    %9 = vector.multi_reduction <add>, %6, %cst_9 [1] : vector<16x32xf32> to vector<16xf32>
    %10 = vector.shape_cast %9 : vector<16xf32> to vector<16x1xf32>
    %cst_10 = arith.constant 3.200000e+01 : f32
    %11 = vector.broadcast %cst_10 : f32 to vector<16x1xf32>
    %12 = arith.divf %10, %11 : vector<16x1xf32>
    %13 = vector.broadcast %12 : vector<16x1xf32> to vector<16x32xf32>
    %14 = arith.subf %6, %13 : vector<16x32xf32>
    %15 = arith.mulf %14, %14 : vector<16x32xf32>
    %cst_11 = arith.constant dense<0.000000e+00> : vector<16xf32>
    %16 = vector.multi_reduction <add>, %15, %cst_11 [1] : vector<16x32xf32> to vector<16xf32>
    %17 = vector.shape_cast %16 : vector<16xf32> to vector<16x1xf32>
    %cst_12 = arith.constant 3.200000e+01 : f32
    %18 = vector.broadcast %cst_12 : f32 to vector<16x1xf32>
    %19 = arith.divf %17, %18 : vector<16x1xf32>
    %cst_13 = arith.constant 9.99999974E-6 : f32
    %20 = vector.broadcast %cst_13 : f32 to vector<16x1xf32>
    %21 = arith.addf %19, %20 : vector<16x1xf32>
    %22 = math.rsqrt %21 : vector<16x1xf32>
    %23 = vector.broadcast %22 : vector<16x1xf32> to vector<16x32xf32>
    %24 = arith.mulf %14, %23 : vector<16x32xf32>
    %25 = vector.broadcast %7 : vector<1x32xf32> to vector<16x32xf32>
    %26 = arith.mulf %24, %25 : vector<16x32xf32>
    %27 = vector.broadcast %8 : vector<1x32xf32> to vector<16x32xf32>
    %28 = arith.addf %26, %27 : vector<16x32xf32>
    %29 = vector.extract_strided_slice %5 {offsets = [0, 160], sizes = [16, 32], strides = [1, 1]} : vector<16x192xf32> to vector<16x32xf32>
    %c0_14 = arith.constant 0 : index
    %c0_15 = arith.constant 0 : index
    %30 = vector.load %arg8[%c0_14, %c0_15] : memref<1x32xf32, #tpu.memory_space<vmem>>, vector<1x32xf32>
    %c0_16 = arith.constant 0 : index
    %c0_17 = arith.constant 0 : index
    %31 = vector.load %arg9[%c0_16, %c0_17] : memref<1x32xf32, #tpu.memory_space<vmem>>, vector<1x32xf32>
    %cst_18 = arith.constant dense<0.000000e+00> : vector<16xf32>
    %32 = vector.multi_reduction <add>, %29, %cst_18 [1] : vector<16x32xf32> to vector<16xf32>
    %33 = vector.shape_cast %32 : vector<16xf32> to vector<16x1xf32>
    %cst_19 = arith.constant 3.200000e+01 : f32
    %34 = vector.broadcast %cst_19 : f32 to vector<16x1xf32>
    %35 = arith.divf %33, %34 : vector<16x1xf32>
    %36 = vector.broadcast %35 : vector<16x1xf32> to vector<16x32xf32>
    %37 = arith.subf %29, %36 : vector<16x32xf32>
    %38 = arith.mulf %37, %37 : vector<16x32xf32>
    %cst_20 = arith.constant dense<0.000000e+00> : vector<16xf32>
    %39 = vector.multi_reduction <add>, %38, %cst_20 [1] : vector<16x32xf32> to vector<16xf32>
    %40 = vector.shape_cast %39 : vector<16xf32> to vector<16x1xf32>
    %cst_21 = arith.constant 3.200000e+01 : f32
    %41 = vector.broadcast %cst_21 : f32 to vector<16x1xf32>
    %42 = arith.divf %40, %41 : vector<16x1xf32>
    %cst_22 = arith.constant 9.99999974E-6 : f32
    %43 = vector.broadcast %cst_22 : f32 to vector<16x1xf32>
    %44 = arith.addf %42, %43 : vector<16x1xf32>
    %45 = math.rsqrt %44 : vector<16x1xf32>
    %46 = vector.broadcast %45 : vector<16x1xf32> to vector<16x32xf32>
    %47 = arith.mulf %37, %46 : vector<16x32xf32>
    %48 = vector.broadcast %30 : vector<1x32xf32> to vector<16x32xf32>
    %49 = arith.mulf %47, %48 : vector<16x32xf32>
    %50 = vector.broadcast %31 : vector<1x32xf32> to vector<16x32xf32>
    %51 = arith.addf %49, %50 : vector<16x32xf32>
    %52 = vector.extract_strided_slice %5 {offsets = [0, 0], sizes = [16, 128], strides = [1, 1]} : vector<16x192xf32> to vector<16x128xf32>
    %cst_23 = arith.constant 5.000000e-01 : f32
    %53 = vector.broadcast %cst_23 : f32 to vector<16x128xf32>
    %54 = arith.mulf %53, %52 : vector<16x128xf32>
    %cst_24 = arith.constant 0.707106769 : f32
    %55 = vector.broadcast %cst_24 : f32 to vector<16x128xf32>
    %56 = arith.mulf %52, %55 : vector<16x128xf32>
    %57 = math.erf %56 : vector<16x128xf32>
    %cst_25 = arith.constant 1.000000e+00 : f32
    %58 = vector.broadcast %cst_25 : f32 to vector<16x128xf32>
    %59 = arith.addf %58, %57 : vector<16x128xf32>
    %60 = arith.mulf %54, %59 : vector<16x128xf32>
    %c0_26 = arith.constant 0 : index
    %c0_27 = arith.constant 0 : index
    %61 = vector.load %arg4[%c0_26, %c0_27] : memref<128x96xf32, #tpu.memory_space<vmem>>, vector<128x96xf32>
    %cst_28 = arith.constant dense<0.000000e+00> : vector<16x96xf32>
    %62 = tpu.matmul %60, %61, %cst_28 {dimension_numbers = #tpu.dot_dimension_numbers<[1], [0], [0], [1], [0, 0, 1, 1], [], []>} : vector<16x128xf32>, vector<128x96xf32>, vector<16x96xf32> -> vector<16x96xf32>
    %c0_29 = arith.constant 0 : index
    %c0_30 = arith.constant 0 : index
    %63 = vector.load %arg5[%c0_29, %c0_30] : memref<1x96xf32, #tpu.memory_space<vmem>>, vector<1x96xf32>
    %64 = vector.broadcast %63 : vector<1x96xf32> to vector<16x96xf32>
    %65 = arith.addf %62, %64 : vector<16x96xf32>
    %c0_31 = arith.constant 0 : index
    %c0_32 = arith.constant 0 : index
    %66 = vector.load %arg10[%c0_31, %c0_32] : memref<1x96xf32, #tpu.memory_space<vmem>>, vector<1x96xf32>
    %c0_33 = arith.constant 0 : index
    %c0_34 = arith.constant 0 : index
    %67 = vector.load %arg11[%c0_33, %c0_34] : memref<1x96xf32, #tpu.memory_space<vmem>>, vector<1x96xf32>
    %cst_35 = arith.constant dense<0.000000e+00> : vector<16xf32>
    %68 = vector.multi_reduction <add>, %65, %cst_35 [1] : vector<16x96xf32> to vector<16xf32>
    %69 = vector.shape_cast %68 : vector<16xf32> to vector<16x1xf32>
    %cst_36 = arith.constant 9.600000e+01 : f32
    %70 = vector.broadcast %cst_36 : f32 to vector<16x1xf32>
    %71 = arith.divf %69, %70 : vector<16x1xf32>
    %72 = vector.broadcast %71 : vector<16x1xf32> to vector<16x96xf32>
    %73 = arith.subf %65, %72 : vector<16x96xf32>
    %74 = arith.mulf %73, %73 : vector<16x96xf32>
    %cst_37 = arith.constant dense<0.000000e+00> : vector<16xf32>
    %75 = vector.multi_reduction <add>, %74, %cst_37 [1] : vector<16x96xf32> to vector<16xf32>
    %76 = vector.shape_cast %75 : vector<16xf32> to vector<16x1xf32>
    %cst_38 = arith.constant 9.600000e+01 : f32
    %77 = vector.broadcast %cst_38 : f32 to vector<16x1xf32>
    %78 = arith.divf %76, %77 : vector<16x1xf32>
    %cst_39 = arith.constant 9.99999974E-6 : f32
    %79 = vector.broadcast %cst_39 : f32 to vector<16x1xf32>
    %80 = arith.addf %78, %79 : vector<16x1xf32>
    %81 = math.rsqrt %80 : vector<16x1xf32>
    %82 = vector.broadcast %81 : vector<16x1xf32> to vector<16x96xf32>
    %83 = arith.mulf %73, %82 : vector<16x96xf32>
    %84 = vector.broadcast %66 : vector<1x96xf32> to vector<16x96xf32>
    %85 = arith.mulf %83, %84 : vector<16x96xf32>
    %86 = vector.broadcast %67 : vector<1x96xf32> to vector<16x96xf32>
    %87 = arith.addf %85, %86 : vector<16x96xf32>
    %88 = tpu.concatenate %28, %51, %87 in 1 : vector<16x32xf32>, vector<16x32xf32>, vector<16x96xf32> -> vector<16x160xf32>
    %c0_40 = arith.constant 0 : index
    %c0_41 = arith.constant 0 : index
    %89 = vector.load %arg12[%c0_40, %c0_41] : memref<16x160xf32, #tpu.memory_space<vmem>>, vector<16x160xf32>
    tpu.vector_store %arg12[%c0_40, %c0_41], %88 {strides = array<i32>} : memref<16x160xf32, #tpu.memory_space<vmem>>, vector<16x160xf32>,
    return
  }
  func.func @transform_0(%arg0: i32) -> (i32, i32) {
    %c0_i32 = arith.constant 0 : i32
    %c0_i32_0 = arith.constant 0 : i32
    return %arg0, %c0_i32 : i32, i32
  }
  func.func @transform_1(%arg0: i32) -> (i32, i32) {
    %c0_i32 = arith.constant 0 : i32
    %c0_i32_0 = arith.constant 0 : i32
    %c0_i32_1 = arith.constant 0 : i32
    return %c0_i32, %c0_i32_0 : i32, i32
  }
  func.func @transform_2(%arg0: i32) -> (i32, i32) {
    %c0_i32 = arith.constant 0 : i32
    %c0_i32_0 = arith.constant 0 : i32
    %c0_i32_1 = arith.constant 0 : i32
    return %c0_i32, %c0_i32_0 : i32, i32
  }
  func.func @transform_3(%arg0: i32) -> (i32, i32) {
    %c0_i32 = arith.constant 0 : i32
    %c0_i32_0 = arith.constant 0 : i32
    %c0_i32_1 = arith.constant 0 : i32
    return %c0_i32, %c0_i32_0 : i32, i32
  }
  func.func @transform_4(%arg0: i32) -> (i32, i32) {
    %c0_i32 = arith.constant 0 : i32
    %c0_i32_0 = arith.constant 0 : i32
    %c0_i32_1 = arith.constant 0 : i32
    return %c0_i32, %c0_i32_0 : i32, i32
  }
  func.func @transform_5(%arg0: i32) -> (i32, i32) {
    %c0_i32 = arith.constant 0 : i32
    %c0_i32_0 = arith.constant 0 : i32
    %c0_i32_1 = arith.constant 0 : i32
    return %c0_i32, %c0_i32_0 : i32, i32
  }
  func.func @transform_6(%arg0: i32) -> (i32, i32) {
    %c0_i32 = arith.constant 0 : i32
    %c0_i32_0 = arith.constant 0 : i32
    %c0_i32_1 = arith.constant 0 : i32
    return %c0_i32, %c0_i32_0 : i32, i32
  }
  func.func @transform_7(%arg0: i32) -> (i32, i32) {
    %c0_i32 = arith.constant 0 : i32
    %c0_i32_0 = arith.constant 0 : i32
    %c0_i32_1 = arith.constant 0 : i32
    return %c0_i32, %c0_i32_0 : i32, i32
  }
  func.func @transform_8(%arg0: i32) -> (i32, i32) {
    %c0_i32 = arith.constant 0 : i32
    %c0_i32_0 = arith.constant 0 : i32
    %c0_i32_1 = arith.constant 0 : i32
    return %c0_i32, %c0_i32_0 : i32, i32
  }
  func.func @transform_9(%arg0: i32) -> (i32, i32) {
    %c0_i32 = arith.constant 0 : i32
    %c0_i32_0 = arith.constant 0 : i32
    %c0_i32_1 = arith.constant 0 : i32
    return %c0_i32, %c0_i32_0 : i32, i32
  }
  func.func @transform_10(%arg0: i32) -> (i32, i32) {
    %c0_i32 = arith.constant 0 : i32
    %c0_i32_0 = arith.constant 0 : i32
    %c0_i32_1 = arith.constant 0 : i32
    return %c0_i32, %c0_i32_0 : i32, i32
  }
  func.func @transform_11(%arg0: i32) -> (i32, i32) {
    %c0_i32 = arith.constant 0 : i32
    %c0_i32_0 = arith.constant 0 : i32
    return %arg0, %c0_i32 : i32, i32
  }
}

</mosaic_0001>

<bundles_post_ra>
// kernel: tpu_custom_call.1
= control target key start
LH: loop header
LB: loop body
LE: loop exit
PB: predicated region body
PF: predicated region fallthrough
CT: control target
= control target key end

     0   :  { %vm70_vm0 = vcmask 1046528   ;;  %v560_v5 = vmov 0.0   ;;  %s778_s0 = inlined_call_operand.vmem [shape: f32[16,39], index: 0, kind: input, shape index: {}]   ;;  %s779_s1 = inlined_call_operand.vmem [shape: f32[39,192], index: 1, kind: input, shape index: {}]   ;;  %s780_s2 = inlined_call_operand.vmem [shape: f32[1,192], index: 2, kind: input, shape index: {}]   ;;  %s781_s3 = inlined_call_operand.vmem [shape: f32[128,96], index: 3, kind: input, shape index: {}]   ;;  %s782_s4 = inlined_call_operand.vmem [shape: f32[1,96], index: 4, kind: input, shape index: {}]   ;;  %s783_s5 = inlined_call_operand.vmem [shape: f32[1,32], index: 5, kind: input, shape index: {}]   ;;  %s784_s6 = inlined_call_operand.vmem [shape: f32[1,32], index: 6, kind: input, shape index: {}]   ;;  %s785_s7 = inlined_call_operand.vmem [shape: f32[1,32], index: 7, kind: input, shape index: {}]   ;;  %s786_s8 = inlined_call_operand.vmem [shape: f32[1,32], index: 8, kind: input, shape index: {}]   ;;  %s787_s9 = inlined_call_operand.vmem [shape: f32[1,96], index: 9, kind: input, shape index: {}]   ;;  %s788_s10 = inlined_call_operand.vmem [shape: f32[1,96], index: 10, kind: input, shape index: {}]   ;;  %s789_s11 = inlined_call_operand.hbm [shape: f32[16,160], index: 11, kind: output, shape index: {}]  }
   0x1   :  { %v50_v0 = vld [vmem:[%s779_s1 + $0x48] sm:$0x7f]  ;;  %v49_v1 = vld [vmem:[%s779_s1 + $0x40] sm:$0x7f]  ;;  %v48_v2 = vld [vmem:[%s779_s1 + $0x38] sm:$0xff]  ;;  %141 = vmatprep.mubr.f32.mxu0 %v560_v5 }
   0x2   :  { %451 = vmatprep.subr.msk.mxu0 %vm70_vm0, %v50_v0  ;;  %v47_v3 = vld [vmem:[%s779_s1 + $0x30] sm:$0xff]  ;;  %v46_v4 = vld [vmem:[%s779_s1 + $0x28] sm:$0xff]  ;;  %v45_v6 = vld [vmem:[%s779_s1 + $0x20] sm:$0xff] }
   0x3   :  { %452 = vmatpush1.msk.msra.mxu0 %vm70_vm0, %v49_v1  ;;  %v44_v7 = vld [vmem:[%s779_s1 + $0x18] sm:$0xff]  ;;  %v288_v9 = vld [vmem:[%s781_s3 + $0x70] sm:$0xff] }
   0x4   :  { %101 = vmatprep.subr.mxu0 %v48_v2  ;;  %v289_v8 = vld [vmem:[%s781_s3 + $0x78] sm:$0xff]  ;;  %v43_v10 = vld [vmem:[%s779_s1 + $0x10] sm:$0xff] }
   0x5   :  { %102 = vmatpush1.msra.mxu0 %v47_v3  ;;  %480 = vmatprep.subr.mxu1 %v289_v8 }
   0x6   :  { %103 = vmatprep.subr.mxu0 %v46_v4 }
   0x7   :  { %16 = vsyncpa [#allocation3], 0  ;;  %104 = vmatpush1.msra.mxu0 %v45_v6  ;;  %v42_v11 = vld [vmem:[%s779_s1 + $0x8] sm:$0xff]  ;;  %481 = vmatpush3.msra.mxu1 %v289_v8  ;;  %v41_v13 = vld [vmem:[%s779_s1] sm:$0xff]  ;;  %vm63_vm1 = vcmask 318464   ;;  %v53_v29 = vlaneseq  ;;  %vm156_vm2 = vcmask 261120  }
   0x8   :  { %v287_v12 = vld [vmem:[%s781_s3 + $0x68] sm:$0xff]  ;;  %105 = vmatprep.subr.mxu0 %v44_v7  ;;  %482 = vmatprep.subr.mxu1 %v288_v9  ;;  %v39_v14 = vld [vmem:[%s778_s0] sm:$0xff]  ;;  %v285_v17 = vld [vmem:[%s781_s3 + $0x58] sm:$0xff]  ;;  %vm374_vm3 = vcmask 785408   ;;  %s562_s16 = smov 32   ;;  %s563_s21 = smov 64  }
   0x9   :  { %106 = vmatpush1.msra.mxu0 %v43_v10  ;;  %483 = vmatpush3.msra.mxu1 %v288_v9  ;;  %v40_v15 = vld [vmem:[%s778_s0 + $0x8] sm:$0xff]  ;;  %v286_v16 = vld [vmem:[%s781_s3 + $0x60] sm:$0xff]  ;;  %v284_v18 = vld [vmem:[%s781_s3 + $0x50] sm:$0xff]  ;;  %v54_v30 = vshrl.u32 %v53_v29, 7  ;;  %vm428_vm4 = vcmask 523264  }
   0xa   :  { %107 = vmatprep.subr.mxu0 %v42_v11  ;;  %484 = vmatprep.subr.mxu1 %v287_v12  ;;  %v283_v19 = vld [vmem:[%s781_s3 + $0x48] sm:$0xff]  ;;  %v282_v20 = vld [vmem:[%s781_s3 + $0x40] sm:$0xff]  ;;  %v281_v21 = vld [vmem:[%s781_s3 + $0x38] sm:$0xff] }
   0xb   :  { %108 = vmatpush1.msra.mxu0 %v41_v13  ;;  %485 = vmatpush3.msra.mxu1 %v287_v12  ;;  %v280_v22 = vld [vmem:[%s781_s3 + $0x30] sm:$0xff]  ;;  %v279_v23 = vld [vmem:[%s781_s3 + $0x28] sm:$0xff]  ;;  %v278_v24 = vld [vmem:[%s781_s3 + $0x20] sm:$0xff]  ;;  %v55_v31 = vsub.s32 0, %v54_v30  ;;  %v59_v33 = vsub.s32 1, %v54_v30 }
   0xc   :  { %453 = vmatmul.mubr.msk.f32.vlgmr.msra.gmra.mxu0 %vm63_vm1, %v39_v14  ;;  %486 = vmatprep.subr.mxu1 %v286_v16  ;;  %v277_v25 = vld [vmem:[%s781_s3 + $0x18] sm:$0xff]  ;;  %v276_v26 = vld [vmem:[%s781_s3 + $0x10] sm:$0xff]  ;;  %v275_v27 = vld [vmem:[%s781_s3 + $0x8] sm:$0xff] }
   0xd   :  { %147 = vmatprep.mubr.f32.mxu0 %v560_v5  ;;  %487 = vmatpush3.msra.mxu1 %v286_v16  ;;  %v274_v28 = vld [vmem:[%s781_s3] sm:$0xff]  ;;  %s561_s3 = smov 96  }
   0xe   :  { %488 = vmatprep.subr.mxu1 %v285_v17  ;;  %v51_v32 = vld [vmem:[%s780_s2] sm:$0x3] }
   0xf   :  { %489 = vmatpush3.msra.mxu1 %v285_v17  ;;  %v56_v34 = vrot.slane %v51_v32, %v55_v31  ;;  %v60_v35 = vrot.slane %v51_v32, %v59_v33  ;;  %v459_v58 = vld [vmem:[%s782_s4] ss:$0 sm:$0xff] }
  0x10   :  { %454 = vmatmul.mubr.msk.f32.gmra.mxu0 %vm63_vm1, %v40_v15  ;;  %490 = vmatprep.subr.mxu1 %v284_v18  ;;  %v458_v33 = vld [vmem:[%s786_s8] ss:$0 sm:$0xff] }
  0x11   :  { %491 = vmatpush3.msra.mxu1 %v284_v18 }
  0x12   :  { %492 = vmatprep.subr.mxu1 %v283_v19 }
  0x13   :  { %493 = vmatpush3.msra.mxu1 %v283_v19 }
  0x14   :  { %494 = vmatprep.subr.mxu1 %v282_v20 }
  0x15   :  { %495 = vmatpush3.msra.mxu1 %v282_v20 }
  0x16   :  { %496 = vmatprep.subr.mxu1 %v281_v21 }
  0x17   :  { %497 = vmatpush3.msra.mxu1 %v281_v21 }
  0x18   :  { %498 = vmatprep.subr.mxu1 %v280_v22 }
  0x19   :  { %499 = vmatpush3.msra.mxu1 %v280_v22 }
  0x1a   :  { %500 = vmatprep.subr.mxu1 %v279_v23 }
  0x1b   :  { %501 = vmatpush3.msra.mxu1 %v279_v23 }
  0x1c   :  { %502 = vmatprep.subr.mxu1 %v278_v24 }
  0x1d   :  { %503 = vmatpush3.msra.mxu1 %v278_v24 }
  0x1e   :  { %504 = vmatprep.subr.mxu1 %v277_v25 }
  0x1f   :  { %505 = vmatpush3.msra.mxu1 %v277_v25 }
  0x20   :  { %506 = vmatprep.subr.mxu1 %v276_v26 }
  0x21   :  { %507 = vmatpush3.msra.mxu1 %v276_v26 }
  0x22   :  { %508 = vmatprep.subr.mxu1 %v275_v27 }
  0x23   :  { %509 = vmatpush3.msra.mxu1 %v275_v27 }
  0x24   :  { %510 = vmatprep.subr.mxu1 %v274_v28 }
  0x25   :  { %511 = vmatpush3.msra.mxu1 %v274_v28 }
  0xcc   :  { %v143_v36 = vpop.f32.mrf.mxu0 }
  0xcd   :  { %v144_v37 = vadd.f32 %v143_v36, %v56_v34  ;;  %v457_v36 = vld [vmem:[%s785_s7] ss:$0 sm:$0xff] }
  0xce   :  { %v145_v38 = vpop.f32.mrf.mxu0 }
  0xcf   :  { %v266_v39 = vmul.f32 0.70710677, %v144_v37  ;;  %v146_v40 = vadd.f32 %v145_v38, %v60_v35  ;;  %v264_v47 = vmul.f32 0.5, %v144_v37 }
  0xd0   :  { %v149_v41 = vpop.f32.mrf.mxu0 }
  0xd1   :  { %522 = verf.f32 %v266_v39  ;;  %v150_v42 = vadd.f32 %v149_v41, %v56_v34  ;;  %204 = vrot.lane.b32.xlu0 %v146_v40, %s561_s3  ;;  %v157_v1 = vsel %vm156_vm2, %v146_v40, 0.0 }
  0xd2   :  { %v151_v43 = vpop.f32.mrf.mxu0 }
  0xd3   :  { %v267_v44 = vmul.f32 0.70710677, %v150_v42  ;;  %v152_v45 = vadd.f32 %v151_v43, %v60_v35  ;;  %v265_v51 = vmul.f32 0.5, %v150_v42 }
  0xd5   :  { %524 = verf.f32 %v267_v44  ;;  %206 = vrot.lane.b32.xlu0 %v152_v45, %s561_s3  ;;  %v160_v2 = vsel %vm156_vm2, %v152_v45, 0.0 }
  0xde   :  { %v523_v46 = vpop.eup %522 }
  0xdf   :  { %v270_v48 = vadd.f32 1.0, %v523_v46 }
  0xe1   :  { %v272_v49 = vmul.f32 %v270_v48, %v264_v47  ;;  %v460_v47 = vld [vmem:[%s787_s9] ss:$0 sm:$0xff] }
  0xe2   :  { %v525_v50 = vpop.eup %524 }
  0xe3   :  { %512 = vmatprep.mubr.f32.mxu1 %v272_v49  ;;  %v271_v52 = vadd.f32 1.0, %v525_v50  ;;  %v461_v49 = vld [vmem:[%s788_s10] ss:$0 sm:$0xff] }
  0xe5   :  { %v273_v53 = vmul.f32 %v271_v52, %v265_v51 }
  0xe7   :  { %513 = vmatmul.mubr.f32.vlgmr.msra.gmra.mxu1 %v273_v53 }
 0x143   :  { %v205_v54 = vpop.permute.xlu0 %204 }
 0x144   :  { %v210_v55 = vsel %vm156_vm2, %v205_v54, 0.0 }
 0x145   :  { %211 = vadd.xlane.f32.xlu1 %v210_v55 }
 0x147   :  { %v207_v56 = vpop.permute.xlu0 %206 }
 0x148   :  { %v213_v57 = vsel %vm156_vm2, %v207_v56, 0.0 }
 0x149   :  { %214 = vadd.xlane.f32.xlu1 %v213_v57 }
 0x1a7   :  { %v514_v59 = vpop.f32.mrf.mxu1 }
 0x1a8   :  { %v369_v60 = vadd.f32 %v514_v59, %v459_v58 }
 0x1a9   :  { %v363_v61 = vpop.f32.mrf.mxu1 }
 0x1aa   :  { %v364_v62 = vadd.f32 %v459_v58, %v363_v61  ;;  %v378_v63 = vsel %vm374_vm3, %v369_v60, 0.0 }
 0x1ab   :  { %379 = vadd.xlane.f32.xlu1 %v378_v63 }
 0x1ac   :  { %v375_v0 = vsel %vm374_vm3, %v364_v62, 0.0 }
 0x1ad   :  { %376 = vadd.xlane.f32.xlu0 %v375_v0 }
 0x1af   :  { %158 = vadd.xlane.f32.xlu1 %v157_v1 }
 0x1b3   :  { %161 = vadd.xlane.f32.xlu1 %v160_v2 }
 0x1ce   :  { %v212_v3 = vpop.xlane.xlu1 %211 }
 0x1cf   :  { %v216_v4 = vmul.f32 0.03125, %v212_v3 }
 0x1d1   :  { %v725_v5 = vsub.f32 %v146_v40, %v216_v4 }
 0x1d2   :  { %v215_v6 = vpop.xlane.xlu1 %214 }
 0x1d3   :  { %v217_v7 = vmul.f32 0.03125, %v215_v6  ;;  %v220_v8 = vmul.f32 %v725_v5, %v725_v5 }
 0x1d5   :  { %v729_v9 = vsub.f32 %v152_v45, %v217_v7  ;;  %224 = vrot.lane.b32.xlu1 %v220_v8, %s561_s3 }
 0x1d7   :  { %v221_v10 = vmul.f32 %v729_v9, %v729_v9 }
 0x1d9   :  { %226 = vrot.lane.b32.xlu1 %v221_v10, %s561_s3  ;;  %v455_v10 = vld [vmem:[%s783_s5] ss:$0 sm:$0xff]  ;;  %s564_s5 = smov [#allocation2]  }
 0x1da   :  { %s440_s24 = sshll.u32 %s564_s5, 4  ;;  %s441_s24 = int_to_ptr.vmem [resolvable:$true] %s440_s24 }
 0x1db   :  { %p543_p1 = scmp.lt.s32.totalorder %s441_s24, %s441_s24 }
 0x234   :  { %v380_v11 = vpop.xlane.xlu1 %379 }
 0x235   :  { %v383_v12 = vmul.f32 0.010416667, %v380_v11 }
 0x236   :  { %v377_v13 = vpop.xlane.xlu0 %376 }
 0x237   :  { %v385_v14 = vsub.f32 %v369_v60, %v383_v12  ;;  %v382_v15 = vmul.f32 0.010416667, %v377_v13 }
 0x238   :  { %v159_v16 = vpop.xlane.xlu1 %158 }
 0x239   :  { %v384_v17 = vsub.f32 %v364_v62, %v382_v15  ;;  %v164_v18 = vmul.f32 0.03125, %v159_v16  ;;  %v387_v19 = vmul.f32 %v385_v14, %v385_v14 }
 0x23b   :  { %v735_v20 = vsub.f32 %v146_v40, %v164_v18  ;;  %v391_v21 = vsel %vm374_vm3, %v387_v19, 0.0  ;;  %v386_v22 = vmul.f32 %v384_v17, %v384_v17 }
 0x23c   :  { %392 = vadd.xlane.f32.xlu1 %v391_v21  ;;  %v162_v23 = vpop.xlane.xlu1 %161 }
 0x23d   :  { %v165_v24 = vmul.f32 0.03125, %v162_v23  ;;  %v388_v25 = vsel %vm374_vm3, %v386_v22, 0.0  ;;  %v168_v26 = vmul.f32 %v735_v20, %v735_v20 }
 0x23e   :  { %389 = vadd.xlane.f32.xlu0 %v388_v25 }
 0x23f   :  { %v741_v27 = vsub.f32 %v152_v45, %v165_v24  ;;  %v170_v28 = vsel %vm156_vm2, %v168_v26, 0.0 }
 0x241   :  { %v169_v29 = vmul.f32 %v741_v27, %v741_v27 }
 0x242   :  { %171 = vadd.xlane.f32.xlu0 %v170_v28 }
 0x243   :  { %v173_v30 = vsel %vm156_vm2, %v169_v29, 0.0 }
 0x246   :  { %174 = vadd.xlane.f32.xlu0 %v173_v30 }
 0x247   :  { %v225_v31 = vpop.permute.xlu1 %224 }
 0x248   :  { %v230_v32 = vsel %vm156_vm2, %v225_v31, 0.0 }
 0x24a   :  { %231 = vadd.xlane.f32.xlu0 %v230_v32 }
 0x24b   :  { %v227_v34 = vpop.permute.xlu1 %226 }
 0x24c   :  { %v233_v35 = vsel %vm156_vm2, %v227_v34, 0.0 }
 0x24d   :  { %259 = vrot.lane.b32.xlu1 %v458_v33, %s562_s16 }
 0x24e   :  { %234 = vadd.xlane.f32.xlu0 %v233_v35 }
 0x264   :  { %249 = vrot.lane.b32.xlu0 %v457_v36, %s562_s16 }
 0x2c5   :  { %v393_v37 = vpop.xlane.xlu1 %392 }
 0x2c6   :  { %v395_v38 = vmul.f32 0.010416667, %v393_v37 }
 0x2c7   :  { %v390_v39 = vpop.xlane.xlu0 %389 }
 0x2c8   :  { %v397_v40 = vadd.f32 1e-05, %v395_v38  ;;  %v394_v41 = vmul.f32 0.010416667, %v390_v39 }
 0x2c9   :  { %v260_v13 = vpop.permute.xlu1 %259 }
 0x2ca   :  { %526 = vrsqrt.f32 %v397_v40  ;;  %v396_v42 = vadd.f32 1e-05, %v394_v41 }
 0x2cb   :  { %v172_v53 = vpop.xlane.xlu0 %171 }
 0x2cc   :  { %528 = vrsqrt.f32 %v396_v42  ;;  %v176_v58 = vmul.f32 0.03125, %v172_v53 }
 0x2ce   :  { %v178_v61 = vadd.f32 1e-05, %v176_v58 }
 0x2cf   :  { %v175_v54 = vpop.xlane.xlu0 %174 }
 0x2d0   :  { %v177_v62 = vmul.f32 0.03125, %v175_v54 }
 0x2d2   :  { %v179_v0 = vadd.f32 1e-05, %v177_v62 }
 0x2d3   :  { %v232_v55 = vpop.xlane.xlu0 %231 }
 0x2d4   :  { %v236_v56 = vmul.f32 0.03125, %v232_v55 }
 0x2d6   :  { %v238_v59 = vadd.f32 1e-05, %v236_v56 }
 0x2d7   :  { %v527_v43 = vpop.eup %526  ;;  %v235_v57 = vpop.xlane.xlu0 %234 }
 0x2d8   :  { %v401_v46 = vmul.f32 %v527_v43, %v385_v14  ;;  %v237_v60 = vmul.f32 0.03125, %v235_v57  ;;  %530 = vrsqrt.f32 %v238_v59 }
 0x2d9   :  { %v529_v44 = vpop.eup %528  ;;  %532 = vrsqrt.f32 %v178_v61 }
 0x2da   :  { %v400_v45 = vmul.f32 %v529_v44, %v384_v17  ;;  %v409_v51 = vmul.f32 %v460_v47, %v401_v46  ;;  %v239_v63 = vadd.f32 1e-05, %v237_v60 }
 0x2db   :  { %v250_v6 = vpop.permute.xlu0 %249 }
 0x2dc   :  { %v408_v48 = vmul.f32 %v460_v47, %v400_v45  ;;  %v417_v52 = vadd.f32 %v461_v49, %v409_v51  ;;  %534 = vrsqrt.f32 %v239_v63 }
 0x2dd   :  { %536 = vrsqrt.f32 %v179_v0 }
 0x2de   :  { %v416_v50 = vadd.f32 %v461_v49, %v408_v48 }
 0x2e0   :  { %420 = vrot.lane.b32.xlu0 %v416_v50, %s563_s21 }
 0x2e4   :  { %422 = vrot.lane.b32.xlu0 %v417_v52, %s563_s21 }
 0x2e5   :  { %v531_v1 = vpop.eup %530 }
 0x2e6   :  { %v533_v2 = vpop.eup %532  ;;  %v242_v3 = vmul.f32 %v531_v1, %v725_v5  ;;  %v456_v5 = vld [vmem:[%s784_s6] ss:$0 sm:$0xff]  ;;  %s538_s6 = scalar_lea.vmem %s441_s24, 512 }
 0x2e7   :  { %v182_v7 = vmul.f32 %v533_v2, %v735_v20  ;;  %p539_p0 = scmp.ne.s32.totalorder %s441_s24, %s538_s6  ;;  %p544_p2 = scmp.lt.s32.totalorder %s538_s6, %s538_s6 }
 0x2e8   :  { %v252_v12 = vmul.f32 %v250_v6, %v242_v3 }
 0x2e9   :  { %v535_v4 = vpop.eup %534  ;;  %v190_v14 = vmul.f32 %v455_v10, %v182_v7  ;;  %p545_p3 = por %p544_p2, %p543_p1 }
 0x2ea   :  { %v537_v8 = vpop.eup %536  ;;  %v243_v11 = vmul.f32 %v535_v4, %v729_v9  ;;  %v262_v17 = vadd.f32 %v260_v13, %v252_v12 }
 0x2eb   :  { %v183_v15 = vmul.f32 %v537_v8, %v741_v27  ;;  %v198_v18 = vadd.f32 %v456_v5, %v190_v14  ;;  %p546_p4 = pnand %p545_p3, %p539_p0 }
 0x2ec   :  { %v253_v16 = vmul.f32 %v250_v6, %v243_v11 }
 0x2ed   :  { %v191_v19 = vmul.f32 %v455_v10, %v183_v15  ;;  %v426_v21 = vsel %vm156_vm2, %v198_v18, %v262_v17 }
 0x2ee   :  { %v263_v20 = vadd.f32 %v260_v13, %v253_v16 }
 0x2ef   :  { %v199_v23 = vadd.f32 %v456_v5, %v191_v19 }
 0x2f1   :  { %v427_v24 = vsel %vm156_vm2, %v199_v23, %v263_v20 }
 0x352   :  { %v421_v22 = vpop.permute.xlu0 %420 }
 0x353   :  { %v429_v9 = vsel %vm428_vm4, %v426_v21, %v421_v22  ;;  %432 = vst.msk [vmem:[#allocation2 + $0x8] sm:$0xff] %vm156_vm2, %v421_v22 }
 0x354   :  { %431 = vst [vmem:[#allocation2] sm:$0xff] %v429_v9 }
 0x356   :  { %v423_v25 = vpop.permute.xlu0 %422 }
 0x357   :  { %v430_v26 = vsel %vm428_vm4, %v427_v24, %v423_v25  ;;  %434 = vst.msk [vmem:[#allocation2 + $0x18] sm:$0xff] %vm156_vm2, %v423_v25 }
 0x358   :  { %433 = vst [vmem:[#allocation2 + $0x10] sm:$0xff] %v430_v26 }
 0x359   :  { %549 = shalt.err (!%p546_p4)
}
 0x35a   :  { %s565_s25 = smov 256   ;;  %s566_s26 = smov 16  }
 0x35b   :  { %446 = dma.vmem_to_hbm [thread:$0]  %s441_s24, 512, %s789_s11, [#allocation3], %s565_s25, %s565_s25, %s566_s26  }
 0x35c   :  { %558 = dma.done.wait [#allocation3], 512  }
 0x35d   :  { %559 = vsyncadd [#allocation3], 4294966784 }
 0x35e   :  { %450 = vsyncpa [#allocation3], 1 }

</bundles_post_ra>
